<compile_context>
chip_gen: v7x
topology: tpu7x:2x2x1
jax: 0.10.0
libtpu: 0.0.40
codegen_flags: <defaults>
</compile_context>

<pallas_src>
import jax
import jax.numpy as jnp
from jax.experimental import pallas as pl
from jax.experimental.pallas import tpu as pltpu


def _act_fn(activation):
    if activation == "tanh":
        return jnp.tanh
    if activation == "relu":
        return lambda z: jnp.maximum(z, 0.0)
    if activation is None:
        return lambda z: z
    raise ValueError(f"unsupported activation: {activation}")


def _make_kernel(h, activation, mxu_dtype, layers_per_step, multi_step):
    act = _act_fn(activation)

    def kernel(x_ref, a_ref, b_ref, o_ref):
        # grid = (batch_tiles [parallel], depth_steps [sequential]); the carry lives in
        # the resident output block (its index_map is constant along the depth axis).
        if multi_step:
            d = pl.program_id(1)

            @pl.when(d == 0)
            def _():
                o_ref[...] = x_ref[...]   # load batch tile into the carry once per tile

            x = o_ref[...]
        else:
            x = x_ref[...]
        x = x.astype(jnp.float32)

        # One fused (TB, D) @ (D, D) MXU matmul per layer (D = dim3*width), mxu_dtype
        # inputs / f32 accumulation; bias + activation + residual on the VPU in f32.
        for l in range(layers_per_step):
            z = jnp.dot(x.astype(mxu_dtype), a_ref[l],
                        preferred_element_type=jnp.float32)
            z = z + b_ref[l]                       # (1, D) broadcast
            x = x + h * act(z)

        o_ref[...] = x.astype(o_ref.dtype)

    return kernel


def _vmem_capacity_bytes():
    try:
        cap = getattr(pltpu.get_tpu_info(), "vmem_capacity_bytes", None)
        if cap:
            return int(cap)
    except Exception:
        pass
    return 64 << 20  # conservative default = v7x per-TensorCore VMEM


def _pick_batch_tile(batch, d_flat, budget_bytes):
    # per-row f32 cost: x-in (2 buffers) + carry/out (2) + ~4 temporaries.
    per_row = 8 * d_flat * 4
    cap_rows = max(8, budget_bytes // per_row)
    tb = batch                       # fallback: whole batch as one full-extent block
    for cand in (1024, 512, 256, 128, 64, 32, 16, 8):
        if cand <= batch and cand <= cap_rows and batch % cand == 0:
            tb = cand
            break
    # Prefer >=2 batch tiles so the "parallel" axis can shard across v7x's 2 TensorCores.
    if batch // tb < 2 and (tb // 2) % 8 == 0:
        tb //= 2
    # TODO(synk): pad ragged batches (batch not a multiple of 8) instead of relying on
    # the whole-batch fallback block.
    return tb


def t_resnet_forward(x, Ws, bs, M, Minv, *, h, activation="tanh",
                     mxu_dtype=jnp.bfloat16, max_layers_per_step=8):
    """x: (width, batch, dim3); Ws: (depth, width, width, dim3); bs: (depth, width, 1, dim3)."""
    width, batch, dim3 = x.shape
    depth = Ws.shape[0]
    D = dim3 * width

    # ---- wrapper-side precompute (plain XLA, runs once per forward) ----
    # Fused per-layer operator  A_d[(s,i),(t,o)] = sum_k M[k,s] Minv[t,k] W_hat_d[o,i,k].
    Mf = M.astype(jnp.float32)
    Mif = Minv.astype(jnp.float32)
    W_hat = jnp.einsum("kq,doiq->doik", Mf, Ws.astype(jnp.float32))
    A = jnp.einsum("ks,tk,doik->dsito", Mf, Mif, W_hat)
    A = A.reshape(depth, D, D).astype(mxu_dtype)                        # (depth, D, D)
    b_flat = jnp.transpose(bs[:, :, 0, :], (0, 2, 1)).reshape(depth, 1, D)
    b_flat = b_flat.astype(jnp.float32)                                 # (depth, 1, D)
    # Lane-dense activations: xk[j, s*width + i] = x[i, j, s]
    xk = jnp.transpose(x, (1, 2, 0)).reshape(batch, D).astype(jnp.float32)

    # ---- generation-aware VMEM budget / tiling ----
    vmem_cap = int(_vmem_capacity_bytes() * 3 // 4)       # ~48 MiB v7x, ~96 MiB v5e/v6e
    a_itm = jnp.dtype(mxu_dtype).itemsize

    def weight_block_bytes(nl):
        return 2 * nl * (D * D * a_itm + D * 4)           # double-buffered A + b blocks

    layers_per_step = 1
    for cand in range(min(max_layers_per_step, depth), 0, -1):
        if depth % cand == 0 and weight_block_bytes(cand) <= vmem_cap // 3:
            layers_per_step = cand
            break
    depth_steps = depth // layers_per_step

    tb = _pick_batch_tile(batch, D,
                          vmem_cap - weight_block_bytes(layers_per_step) - (4 << 20))
    num_bt = batch // tb

    need = 8 * tb * D * 4 + weight_block_bytes(layers_per_step) + (4 << 20)
    vmem_limit = int(min(max(need, 32 << 20), vmem_cap))

    out = pl.pallas_call(
        _make_kernel(float(h), activation, mxu_dtype, layers_per_step,
                     multi_step=depth_steps > 1),
        out_shape=jax.ShapeDtypeStruct((batch, D), jnp.float32),
        grid=(num_bt, depth_steps),
        in_specs=[
            pl.BlockSpec((tb, D), lambda bt, d: (bt, 0)),                    # x tile
            pl.BlockSpec((layers_per_step, D, D), lambda bt, d: (d, 0, 0)),  # A block
            pl.BlockSpec((layers_per_step, 1, D), lambda bt, d: (d, 0, 0)),  # bias block
        ],
        out_specs=pl.BlockSpec((tb, D), lambda bt, d: (bt, 0)),              # carry/out
        compiler_params=pltpu.CompilerParams(
            dimension_semantics=("parallel", "arbitrary"),
            vmem_limit_bytes=vmem_limit,
        ),
    )(xk, A, b_flat)
    # TODO(synk): when depth_steps > 1 and num_bt > 1, the A blocks are re-streamed from
    # HBM for every batch tile; keep the full A resident in VMEM (untiled spec) when it
    # fits to save HBM bandwidth on v5e.

    out = out.reshape(batch, dim3, width)
    return jnp.transpose(out, (2, 0, 1)).astype(x.dtype)     # back to (width, batch, dim3)


def t_resnet_reference(x, Ws, bs, M, Minv, *, h, activation="tanh"):
    """Pure-JAX reference with the math-convention layout (width, batch, dim3)."""
    act = _act_fn(activation)
    for d in range(Ws.shape[0]):
        W, b = Ws[d], bs[d]
        x_hat = jnp.einsum("kt,ijt->ijk", M, x)
        w_hat = jnp.einsum("kt,oit->oik", M, W)
        z_hat = jnp.einsum("oik,ijk->ojk", w_hat, x_hat)
        z = jnp.einsum("tk,ojk->ojt", Minv, z_hat) + b
        x = x + h * act(z)
    return x


if __name__ == "__main__":
    width, dim3, depth, batch = 32, 4, 3, 8
    h = 0.1

    key = jax.random.PRNGKey(0)
    kx, kw, kb = jax.random.split(key, 3)
    x = jax.random.normal(kx, (width, batch, dim3), dtype=jnp.float32)
    Ws = 0.1 * jax.random.normal(kw, (depth, width, width, dim3), dtype=jnp.float32)
    bs = 0.1 * jax.random.normal(kb, (depth, width, 1, dim3), dtype=jnp.float32)

    # Orthonormal DCT-II matrix as the tube transform M (so M^{-1} = M^T).
    n = jnp.arange(dim3, dtype=jnp.float32)
    M = jnp.sqrt(2.0 / dim3) * jnp.cos(
        jnp.pi * (2.0 * n[None, :] + 1.0) * n[:, None] / (2.0 * dim3))
    M = M.at[0].set(M[0] / jnp.sqrt(2.0))
    Minv = M.T

    ref = t_resnet_reference(x, Ws, bs, M, Minv, h=h, activation="tanh")

    # f32-MXU path, all layers fused into one grid step: tight tolerance.
    out_f32 = jax.block_until_ready(
        t_resnet_forward(x, Ws, bs, M, Minv, h=h, activation="tanh",
                         mxu_dtype=jnp.float32))
    # bf16-MXU path (default / fast): looser tolerance (bf16 matmul inputs).
    out_bf16 = jax.block_until_ready(
        t_resnet_forward(x, Ws, bs, M, Minv, h=h, activation="tanh",
                         mxu_dtype=jnp.bfloat16))
    # One-layer-per-grid-step path to exercise the resident-carry (multi-step) code.
    out_multi = jax.block_until_ready(
        t_resnet_forward(x, Ws, bs, M, Minv, h=h, activation="tanh",
                         mxu_dtype=jnp.float32, max_layers_per_step=1))

    assert (out_f32.shape == out_bf16.shape == out_multi.shape == ref.shape
            == (width, batch, dim3))
    err_f32 = float(jnp.max(jnp.abs(out_f32 - ref)))
    err_multi = float(jnp.max(jnp.abs(out_multi - ref)))
    err_bf16 = float(jnp.max(jnp.abs(out_bf16 - ref)))
    if err_f32 < 1e-3 and err_multi < 1e-3 and err_bf16 < 5e-2:
        print("KERNEL_OK")
    else:
        print(f"MISMATCH f32_err={err_f32} multi_err={err_multi} bf16_err={err_bf16}")
</pallas_src>

<mosaic_0001>
module attributes {stable_mosaic.version = 11 : i64} {
  func.func @kernel(%arg0: i32, %arg1: i32, %arg2: memref<8x128xf32, #tpu.memory_space<vmem>>, %arg3: memref<3x128x128xf32, #tpu.memory_space<vmem>>, %arg4: memref<3x1x128xf32, #tpu.memory_space<vmem>>, %arg5: memref<8x128xf32, #tpu.memory_space<vmem>>) attributes {dimension_semantics = [#tpu.dimension_semantics<parallel>, #tpu.dimension_semantics<arbitrary>], iteration_bounds = array<i64: 1, 1>, scalar_prefetch = 0 : i64, scratch_operands = 0 : i64, tpu.core_type = #tpu.core_type<tc>, window_params = [{transform_indices = @transform_0, window_bounds = array<i64: 8, 128>}, {transform_indices = @transform_1, window_bounds = array<i64: 3, 128, 128>}, {transform_indices = @transform_2, window_bounds = array<i64: 3, 1, 128>}, {transform_indices = @transform_3, window_bounds = array<i64: 8, 128>}]} {
    %c0 = arith.constant 0 : index
    %c0_0 = arith.constant 0 : index
    %0 = vector.load %arg2[%c0, %c0_0] : memref<8x128xf32, #tpu.memory_space<vmem>>, vector<8x128xf32>
    %c0_1 = arith.constant 0 : index
    %c0_2 = arith.constant 0 : index
    %c0_3 = arith.constant 0 : index
    %1 = vector.load %arg3[%c0_1, %c0_2, %c0_3] : memref<3x128x128xf32, #tpu.memory_space<vmem>>, vector<1x128x128xf32>
    %2 = vector.shape_cast %1 : vector<1x128x128xf32> to vector<128x128xf32>
    %cst = arith.constant dense<0.000000e+00> : vector<8x128xf32>
    %3 = tpu.matmul %0, %2, %cst {dimension_numbers = #tpu.dot_dimension_numbers<[1], [0], [0], [1], [0, 0, 1, 1], [], []>} : vector<8x128xf32>, vector<128x128xf32>, vector<8x128xf32> -> vector<8x128xf32>
    %c0_4 = arith.constant 0 : index
    %c0_5 = arith.constant 0 : index
    %c0_6 = arith.constant 0 : index
    %4 = vector.load %arg4[%c0_4, %c0_5, %c0_6] : memref<3x1x128xf32, #tpu.memory_space<vmem>>, vector<1x1x128xf32>
    %5 = vector.shape_cast %4 : vector<1x1x128xf32> to vector<1x128xf32>
    %6 = vector.broadcast %5 : vector<1x128xf32> to vector<8x128xf32>
    %7 = arith.addf %3, %6 : vector<8x128xf32>
    %8 = math.tanh %7 : vector<8x128xf32>
    %cst_7 = arith.constant 1.000000e-01 : f32
    %9 = vector.broadcast %cst_7 : f32 to vector<8x128xf32>
    %10 = arith.mulf %9, %8 : vector<8x128xf32>
    %11 = arith.addf %0, %10 : vector<8x128xf32>
    %c1 = arith.constant 1 : index
    %c0_8 = arith.constant 0 : index
    %c0_9 = arith.constant 0 : index
    %12 = vector.load %arg3[%c1, %c0_8, %c0_9] : memref<3x128x128xf32, #tpu.memory_space<vmem>>, vector<1x128x128xf32>
    %13 = vector.shape_cast %12 : vector<1x128x128xf32> to vector<128x128xf32>
    %cst_10 = arith.constant dense<0.000000e+00> : vector<8x128xf32>
    %14 = tpu.matmul %11, %13, %cst_10 {dimension_numbers = #tpu.dot_dimension_numbers<[1], [0], [0], [1], [0, 0, 1, 1], [], []>} : vector<8x128xf32>, vector<128x128xf32>, vector<8x128xf32> -> vector<8x128xf32>
    %c1_11 = arith.constant 1 : index
    %c0_12 = arith.constant 0 : index
    %c0_13 = arith.constant 0 : index
    %15 = vector.load %arg4[%c1_11, %c0_12, %c0_13] : memref<3x1x128xf32, #tpu.memory_space<vmem>>, vector<1x1x128xf32>
    %16 = vector.shape_cast %15 : vector<1x1x128xf32> to vector<1x128xf32>
    %17 = vector.broadcast %16 : vector<1x128xf32> to vector<8x128xf32>
    %18 = arith.addf %14, %17 : vector<8x128xf32>
    %19 = math.tanh %18 : vector<8x128xf32>
    %cst_14 = arith.constant 1.000000e-01 : f32
    %20 = vector.broadcast %cst_14 : f32 to vector<8x128xf32>
    %21 = arith.mulf %20, %19 : vector<8x128xf32>
    %22 = arith.addf %11, %21 : vector<8x128xf32>
    %c2 = arith.constant 2 : index
    %c0_15 = arith.constant 0 : index
    %c0_16 = arith.constant 0 : index
    %23 = vector.load %arg3[%c2, %c0_15, %c0_16] : memref<3x128x128xf32, #tpu.memory_space<vmem>>, vector<1x128x128xf32>
    %24 = vector.shape_cast %23 : vector<1x128x128xf32> to vector<128x128xf32>
    %cst_17 = arith.constant dense<0.000000e+00> : vector<8x128xf32>
    %25 = tpu.matmul %22, %24, %cst_17 {dimension_numbers = #tpu.dot_dimension_numbers<[1], [0], [0], [1], [0, 0, 1, 1], [], []>} : vector<8x128xf32>, vector<128x128xf32>, vector<8x128xf32> -> vector<8x128xf32>
    %c2_18 = arith.constant 2 : index
    %c0_19 = arith.constant 0 : index
    %c0_20 = arith.constant 0 : index
    %26 = vector.load %arg4[%c2_18, %c0_19, %c0_20] : memref<3x1x128xf32, #tpu.memory_space<vmem>>, vector<1x1x128xf32>
    %27 = vector.shape_cast %26 : vector<1x1x128xf32> to vector<1x128xf32>
    %28 = vector.broadcast %27 : vector<1x128xf32> to vector<8x128xf32>
    %29 = arith.addf %25, %28 : vector<8x128xf32>
    %30 = math.tanh %29 : vector<8x128xf32>
    %cst_21 = arith.constant 1.000000e-01 : f32
    %31 = vector.broadcast %cst_21 : f32 to vector<8x128xf32>
    %32 = arith.mulf %31, %30 : vector<8x128xf32>
    %33 = arith.addf %22, %32 : vector<8x128xf32>
    %c0_22 = arith.constant 0 : index
    %c0_23 = arith.constant 0 : index
    %34 = vector.load %arg5[%c0_22, %c0_23] : memref<8x128xf32, #tpu.memory_space<vmem>>, vector<8x128xf32>
    tpu.vector_store %arg5[%c0_22, %c0_23], %33 {strides = array<i32>} : memref<8x128xf32, #tpu.memory_space<vmem>>, vector<8x128xf32>,
    return
  }
  func.func @transform_0(%arg0: i32, %arg1: i32) -> (i32, i32) {
    %c0_i32 = arith.constant 0 : i32
    %c0_i32_0 = arith.constant 0 : i32
    return %arg0, %c0_i32 : i32, i32
  }
  func.func @transform_1(%arg0: i32, %arg1: i32) -> (i32, i32, i32) {
    %c0_i32 = arith.constant 0 : i32
    %c0_i32_0 = arith.constant 0 : i32
    %c0_i32_1 = arith.constant 0 : i32
    return %arg1, %c0_i32, %c0_i32_0 : i32, i32, i32
  }
  func.func @transform_2(%arg0: i32, %arg1: i32) -> (i32, i32, i32) {
    %c0_i32 = arith.constant 0 : i32
    %c0_i32_0 = arith.constant 0 : i32
    %c0_i32_1 = arith.constant 0 : i32
    return %arg1, %c0_i32, %c0_i32_0 : i32, i32, i32
  }
  func.func @transform_3(%arg0: i32, %arg1: i32) -> (i32, i32) {
    %c0_i32 = arith.constant 0 : i32
    %c0_i32_0 = arith.constant 0 : i32
    return %arg0, %c0_i32 : i32, i32
  }
}

</mosaic_0001>

<bundles_post_ra>
// kernel: tpu_custom_call.1
= control target key start
LH: loop header
LB: loop body
LE: loop exit
PB: predicated region body
PF: predicated region fallthrough
CT: control target
= control target key end

     0   :  { %8 = vsyncpa [#allocation3], 0  ;;  %s780_s0 = inlined_call_operand.hbm [shape: f32[8,128], index: 0, kind: input, shape index: {}]   ;;  %s781_s1 = inlined_call_operand.hbm [shape: f32[3,128,128], index: 1, kind: input, shape index: {}]   ;;  %s782_s2 = inlined_call_operand.vmem [shape: f32[3,1,128], index: 2, kind: input, shape index: {}]   ;;  %s783_s3 = inlined_call_operand.hbm [shape: f32[8,128], index: 3, kind: output, shape index: {}]  }
   0x1   :  { %9 = vsyncpa [#allocation6], 0 }
   0x2   :  { %10 = vsyncpa [#allocation4], 0  ;;  %s670_s12 = smov [#allocation2]   ;;  %s671_s14 = smov [#allocation5]  }
   0x3   :  { %s17_s13 = sshll.u32 %s670_s12, 4  ;;  %s26_s15 = sshll.u32 %s671_s14, 4  ;;  %s18_s13 = int_to_ptr.vmem [resolvable:$true] %s17_s13  ;;  %s698_s15 = int_to_ptr.vmem [resolvable:$true] %s26_s15 }
   0x4   :  { %s598_s18 = scalar_lea.hbm %s780_s0, 128 }
   0x5   :  { %p599_p0 = scmp.ne.s32.totalorder %s780_s0, %s598_s18  ;;  %p602_p1 = scmp.lt.u32.totalorder %s598_s18, %s780_s0 }
   0x7   :  { %p604_p2 = pnand %p602_p1, %p599_p0 }
   0x9   :  { %607 = shalt.err (!%p604_p2)
}
   0xa   :  { %s608_s23 = scalar_lea.vmem %s18_s13, 128  ;;  %p613_p4 = scmp.lt.s32.totalorder %s18_s13, %s18_s13 }
   0xb   :  { %p609_p3 = scmp.ne.s32.totalorder %s18_s13, %s608_s23  ;;  %p614_p5 = scmp.lt.s32.totalorder %s608_s23, %s608_s23 }
   0xd   :  { %p615_p6 = por %p614_p5, %p613_p4 }
   0xf   :  { %p616_p7 = pnand %p615_p6, %p609_p3 }
  0x11   :  { %619 = shalt.err (!%p616_p7)
}
  0x12   :  { %20 = dma.hbm_to_vmem [thread:$0]  %s780_s0, 128, %s18_s13, [#allocation3]  }
  0x13   :  { %s620_s28 = scalar_lea.hbm %s781_s1, 6144 }
  0x14   :  { %p621_p8 = scmp.ne.s32.totalorder %s781_s1, %s620_s28  ;;  %p624_p9 = scmp.lt.u32.totalorder %s620_s28, %s781_s1 }
  0x16   :  { %p626_p10 = pnand %p624_p9, %p621_p8 }
  0x18   :  { %629 = shalt.err (!%p626_p10)
}
  0x19   :  { %s630_s6 = scalar_lea.vmem %s698_s15, 6144  ;;  %p635_p12 = scmp.lt.s32.totalorder %s698_s15, %s698_s15 }
  0x1a   :  { %p631_p11 = scmp.ne.s32.totalorder %s698_s15, %s630_s6  ;;  %p636_p13 = scmp.lt.s32.totalorder %s630_s6, %s630_s6 }
  0x1c   :  { %p637_p0 = por %p636_p13, %p635_p12 }
  0x1e   :  { %p638_p1 = pnand %p637_p0, %p631_p11 }
  0x20   :  { %641 = shalt.err (!%p638_p1)
}
  0x21   :  { %s672_s0 = smov 128   ;;  %s673_s7 = smov 8  }
  0x22   :  { %32 = dma.hbm_to_vmem [thread:$0]  %s781_s1, 6144, %s698_s15, [#allocation6], %s672_s0, %s672_s0, %s673_s7  }
  0x23   :  { %664 = dma.done.wait [#allocation3], 128  }
  0x24   :  { %665 = vsyncadd [#allocation3], 4294967168 }
  0x25   :  { %666 = dma.done.wait [#allocation6], 6144  }
  0x26   :  { %667 = vsyncadd [#allocation6], 4294961152  ;;  %v674_v0 = vmov 0.0|0.0   ;;  %vm675_vm0 = vmmov 0   ;;  %v676_v1 = vmov 0.0   ;;  %v42_v2 = vld [vmem:[#allocation5] sm:$0xff] }
  0x27   :  { %512 = vmatprep.subr.bf16.mxu0 %v674_v0  ;;  %439 = vmatprep.mubr.msk.f32.mxu0 %vm675_vm0, %v676_v1  ;;  %v43_v3 = vld [vmem:[#allocation5 + $0x8] sm:$0xff]  ;;  %v44_v4 = vld [vmem:[#allocation5 + $0x10] sm:$0xff]  ;;  %v45_v6 = vld [vmem:[#allocation5 + $0x18] sm:$0xff]  ;;  %s677_s15 = smov [#allocation7]  }
  0x28   :  { %536 = vmatprep.subr.bf16.mxu1 %v674_v0  ;;  %474 = vmatprep.mubr.msk.f32.mxu1 %vm675_vm0, %v676_v1  ;;  %v513_v5 = vpack.c.bf16 %v43_v3, %v42_v2  ;;  %v516_v7 = vpack.c.bf16 %v45_v6, %v44_v4  ;;  %v46_v8 = vld [vmem:[#allocation5 + $0x20] sm:$0xff]  ;;  %v47_v9 = vld [vmem:[#allocation5 + $0x28] sm:$0xff]  ;;  %v141_v12 = vld [vmem:[#allocation5 + $0x90] sm:$0xff]  ;;  %s341_s16 = sshll.u32 %s677_s15, 4  ;;  %s342_s16 = int_to_ptr.vmem [resolvable:$true] %s341_s16 }
  0x29   :  { %v139_v10 = vld [vmem:[#allocation5 + $0x80] sm:$0xff]  ;;  %v140_v11 = vld [vmem:[#allocation5 + $0x88] sm:$0xff]  ;;  %v142_v13 = vld [vmem:[#allocation5 + $0x98] sm:$0xff]  ;;  %v519_v14 = vpack.c.bf16 %v47_v9, %v46_v8  ;;  %s642_s17 = scalar_lea.vmem %s342_s16, 128  ;;  %p647_p3 = scmp.lt.s32.totalorder %s342_s16, %s342_s16 }
  0x2a   :  { %514 = vmatpush3.bf16.msra.mxu0 %v513_v5  ;;  %v537_v15 = vpack.c.bf16 %v140_v11, %v139_v10  ;;  %v48_v16 = vld [vmem:[#allocation5 + $0x30] sm:$0xff]  ;;  %v49_v17 = vld [vmem:[#allocation5 + $0x38] sm:$0xff]  ;;  %v540_v18 = vpack.c.bf16 %v142_v13, %v141_v12  ;;  %v143_v19 = vld [vmem:[#allocation5 + $0xa0] sm:$0xff]  ;;  %p643_p2 = scmp.ne.s32.totalorder %s342_s16, %s642_s17  ;;  %p648_p4 = scmp.lt.s32.totalorder %s642_s17, %s642_s17 }
  0x2b   :  { %515 = vmatprep.subr.bf16.mxu0 %v674_v0  ;;  %v144_v20 = vld [vmem:[#allocation5 + $0xa8] sm:$0xff]  ;;  %v522_v21 = vpack.c.bf16 %v49_v17, %v48_v16  ;;  %v50_v22 = vld [vmem:[#allocation5 + $0x40] sm:$0xff]  ;;  %v145_v25 = vld [vmem:[#allocation5 + $0xb0] sm:$0xff] }
  0x2c   :  { %538 = vmatpush3.bf16.msra.mxu1 %v537_v15  ;;  %v51_v23 = vld [vmem:[#allocation5 + $0x48] sm:$0xff]  ;;  %v543_v24 = vpack.c.bf16 %v144_v20, %v143_v19  ;;  %v146_v26 = vld [vmem:[#allocation5 + $0xb8] sm:$0xff]  ;;  %v52_v28 = vld [vmem:[#allocation5 + $0x50] sm:$0xff]  ;;  %p649_p5 = por %p648_p4, %p647_p3 }
  0x2d   :  { %539 = vmatprep.subr.bf16.mxu1 %v674_v0  ;;  %v525_v27 = vpack.c.bf16 %v51_v23, %v50_v22  ;;  %v53_v29 = vld [vmem:[#allocation5 + $0x58] sm:$0xff]  ;;  %v546_v30 = vpack.c.bf16 %v146_v26, %v145_v25  ;;  %v54_v32 = vld [vmem:[#allocation5 + $0x60] sm:$0xff]  ;;  %v55_v33 = vld [vmem:[#allocation5 + $0x68] sm:$0xff] }
  0x2e   :  { %517 = vmatpush3.bf16.msra.mxu0 %v516_v7  ;;  %v528_v31 = vpack.c.bf16 %v53_v29, %v52_v28  ;;  %v531_v34 = vpack.c.bf16 %v55_v33, %v54_v32  ;;  %v56_v35 = vld [vmem:[#allocation5 + $0x70] sm:$0xff]  ;;  %v57_v36 = vld [vmem:[#allocation5 + $0x78] sm:$0xff]  ;;  %v147_v39 = vld [vmem:[#allocation5 + $0xc0] sm:$0xff]  ;;  %p650_p6 = pnand %p649_p5, %p643_p2 }
  0x2f   :  { %518 = vmatprep.subr.bf16.mxu0 %v674_v0  ;;  %v534_v37 = vpack.c.bf16 %v57_v36, %v56_v35  ;;  %v41_v38 = vld [vmem:[#allocation2] sm:$0xff]  ;;  %v148_v40 = vld [vmem:[#allocation5 + $0xc8] sm:$0xff]  ;;  %v149_v42 = vld [vmem:[#allocation5 + $0xd0] sm:$0xff] }
  0x30   :  { %541 = vmatpush3.bf16.msra.mxu1 %v540_v18  ;;  %v549_v41 = vpack.c.bf16 %v148_v40, %v147_v39  ;;  %v150_v43 = vld [vmem:[#allocation5 + $0xd8] sm:$0xff]  ;;  %v151_v45 = vld [vmem:[#allocation5 + $0xe0] sm:$0xff]  ;;  %v152_v46 = vld [vmem:[#allocation5 + $0xe8] sm:$0xff] }
  0x31   :  { %542 = vmatprep.subr.bf16.mxu1 %v674_v0  ;;  %v552_v44 = vpack.c.bf16 %v150_v43, %v149_v42  ;;  %v555_v47 = vpack.c.bf16 %v152_v46, %v151_v45  ;;  %v153_v48 = vld [vmem:[#allocation5 + $0xf0] sm:$0xff]  ;;  %v154_v49 = vld [vmem:[#allocation5 + $0xf8] sm:$0xff]  ;;  %v237_v51 = vld [vmem:[#allocation5 + $0x100] sm:$0xff] }
  0x32   :  { %520 = vmatpush3.bf16.msra.mxu0 %v519_v14  ;;  %v558_v50 = vpack.c.bf16 %v154_v49, %v153_v48  ;;  %v238_v52 = vld [vmem:[#allocation5 + $0x108] sm:$0xff]  ;;  %v239_v53 = vld [vmem:[#allocation5 + $0x110] sm:$0xff]  ;;  %v240_v55 = vld [vmem:[#allocation5 + $0x118] sm:$0xff] }
  0x33   :  { %521 = vmatprep.subr.bf16.mxu0 %v674_v0  ;;  %v561_v54 = vpack.c.bf16 %v238_v52, %v237_v51  ;;  %v564_v56 = vpack.c.bf16 %v240_v55, %v239_v53  ;;  %v241_v57 = vld [vmem:[#allocation5 + $0x120] sm:$0xff]  ;;  %v242_v58 = vld [vmem:[#allocation5 + $0x128] sm:$0xff]  ;;  %v243_v60 = vld [vmem:[#allocation5 + $0x130] sm:$0xff] }
  0x34   :  { %544 = vmatpush3.bf16.msra.mxu1 %v543_v24  ;;  %v567_v59 = vpack.c.bf16 %v242_v58, %v241_v57  ;;  %v244_v61 = vld [vmem:[#allocation5 + $0x138] sm:$0xff]  ;;  %v245_v7 = vld [vmem:[#allocation5 + $0x140] sm:$0xff]  ;;  %v246_v8 = vld [vmem:[#allocation5 + $0x148] sm:$0xff] }
  0x35   :  { %545 = vmatprep.subr.bf16.mxu1 %v674_v0  ;;  %v570_v62 = vpack.c.bf16 %v244_v61, %v243_v60  ;;  %v351_v63 = vld [vmem:[%s782_s2] ss:$0 sm:$0xff]  ;;  %v573_v9 = vpack.c.bf16 %v246_v8, %v245_v7  ;;  %v247_v10 = vld [vmem:[#allocation5 + $0x150] sm:$0xff]  ;;  %v249_v13 = vld [vmem:[#allocation5 + $0x160] sm:$0xff] }
  0x36   :  { %523 = vmatpush3.bf16.msra.mxu0 %v522_v21  ;;  %v248_v11 = vld [vmem:[#allocation5 + $0x158] sm:$0xff]  ;;  %v250_v14 = vld [vmem:[#allocation5 + $0x168] sm:$0xff]  ;;  %v251_v16 = vld [vmem:[#allocation5 + $0x170] sm:$0xff] }
  0x37   :  { %524 = vmatprep.subr.bf16.mxu0 %v674_v0  ;;  %v576_v12 = vpack.c.bf16 %v248_v11, %v247_v10  ;;  %v579_v15 = vpack.c.bf16 %v250_v14, %v249_v13  ;;  %v252_v17 = vld [vmem:[#allocation5 + $0x178] sm:$0xff] }
  0x38   :  { %547 = vmatpush3.bf16.msra.mxu1 %v546_v30  ;;  %v582_v18 = vpack.c.bf16 %v252_v17, %v251_v16  ;;  %v353_v19 = vld [vmem:[%s782_s2 + $0x1] ss:$0 sm:$0xff] }
  0x39   :  { %548 = vmatprep.subr.bf16.mxu1 %v674_v0 }
  0x3a   :  { %526 = vmatpush3.bf16.msra.mxu0 %v525_v27 }
  0x3b   :  { %527 = vmatprep.subr.bf16.mxu0 %v674_v0 }
  0x3c   :  { %550 = vmatpush3.bf16.msra.mxu1 %v549_v41 }
  0x3d   :  { %551 = vmatprep.subr.bf16.mxu1 %v674_v0 }
  0x3e   :  { %529 = vmatpush3.bf16.msra.mxu0 %v528_v31 }
  0x3f   :  { %530 = vmatprep.subr.bf16.mxu0 %v674_v0 }
  0x40   :  { %553 = vmatpush3.bf16.msra.mxu1 %v552_v44 }
  0x41   :  { %554 = vmatprep.subr.bf16.mxu1 %v674_v0 }
  0x42   :  { %532 = vmatpush3.bf16.msra.mxu0 %v531_v34 }
  0x43   :  { %533 = vmatprep.subr.bf16.mxu0 %v674_v0 }
  0x44   :  { %556 = vmatpush3.bf16.msra.mxu1 %v555_v47 }
  0x45   :  { %557 = vmatprep.subr.bf16.mxu1 %v674_v0 }
  0x46   :  { %535 = vmatpush3.bf16.msra.mxu0 %v534_v37 }
  0x47   :  { %560 = vmatprep.subr.bf16.mxu0 %v674_v0 }
  0x48   :  { %559 = vmatpush3.bf16.msra.mxu1 %v558_v50 }
  0x49   :  { %440 = vmatmul.mubr.f32.vlgmr.msra.gmra.mrb[0].mxu0 %v41_v38 }
  0x4a   :  { %509 = vmatprep.mubr.msk.f32.mxu0 %vm675_vm0, %v676_v1  ;;  %562 = vmatpush3.bf16.msra.mxu0 %v561_v54 }
  0x4b   :  { %563 = vmatprep.subr.bf16.mxu0 %v674_v0 }
  0x4e   :  { %565 = vmatpush3.bf16.msra.mxu0 %v564_v56 }
  0x4f   :  { %566 = vmatprep.subr.bf16.mxu0 %v674_v0 }
  0x52   :  { %568 = vmatpush3.bf16.msra.mxu0 %v567_v59 }
  0x53   :  { %569 = vmatprep.subr.bf16.mxu0 %v674_v0 }
  0x56   :  { %571 = vmatpush3.bf16.msra.mxu0 %v570_v62 }
  0x57   :  { %572 = vmatprep.subr.bf16.mxu0 %v674_v0 }
  0x5a   :  { %574 = vmatpush3.bf16.msra.mxu0 %v573_v9 }
  0x5b   :  { %575 = vmatprep.subr.bf16.mxu0 %v674_v0 }
  0x5e   :  { %577 = vmatpush3.bf16.msra.mxu0 %v576_v12 }
  0x5f   :  { %578 = vmatprep.subr.bf16.mxu0 %v674_v0 }
  0x62   :  { %580 = vmatpush3.bf16.msra.mxu0 %v579_v15 }
  0x63   :  { %581 = vmatprep.subr.bf16.mxu0 %v674_v0  ;;  %v355_v0 = vld [vmem:[%s782_s2 + $0x2] ss:$0 sm:$0xff] }
  0x66   :  { %583 = vmatpush3.bf16.msra.mxu0 %v582_v18 }
 0x11c   :  { %v131_v1 = vpop.f32.mrb[0].mxu0 }
 0x11d   :  { %v132_v2 = vadd.f32 %v351_v63, %v131_v1  ;;  %v441_v3 = vpop.f32.mrb[1].mxu0 }
 0x11f   :  { %592 = vtanh.f32 %v132_v2 }
 0x129   :  { %v593_v4 = vpop.eup %592 }
 0x12a   :  { %v136_v5 = vmul.f32 0.1, %v593_v4 }
 0x12c   :  { %v137_v6 = vadd.f32 %v136_v5, %v41_v38 }
 0x12e   :  { %475 = vmatmul.mubr.f32.vlgmr.msra.gmra.mrb[0].mxu1 %v137_v6 }
 0x201   :  { %v229_v20 = vpop.f32.mrb[0].mxu1 }
 0x202   :  { %v230_v21 = vadd.f32 %v353_v19, %v229_v20  ;;  %v476_v22 = vpop.f32.mrb[1].mxu1 }
 0x204   :  { %594 = vtanh.f32 %v230_v21 }
 0x20e   :  { %v595_v23 = vpop.eup %594 }
 0x20f   :  { %v234_v24 = vmul.f32 0.1, %v595_v23 }
 0x211   :  { %v235_v25 = vadd.f32 %v234_v24, %v137_v6 }
 0x213   :  { %510 = vmatmul.mubr.f32.vlgmr.msra.gmra.mrb[2].mxu0 %v235_v25 }
 0x2e6   :  { %v327_v26 = vpop.f32.mrb[2].mxu0 }
 0x2e7   :  { %v328_v27 = vadd.f32 %v355_v0, %v327_v26  ;;  %v511_v28 = vpop.f32.mrb[3].mxu0 }
 0x2e9   :  { %596 = vtanh.f32 %v328_v27 }
 0x2f3   :  { %v597_v29 = vpop.eup %596 }
 0x2f4   :  { %v332_v30 = vmul.f32 0.1, %v597_v29 }
 0x2f6   :  { %v333_v31 = vadd.f32 %v332_v30, %v235_v25 }
 0x2f8   :  { %334 = vst [vmem:[#allocation7] sm:$0xff] %v333_v31 }
 0x2f9   :  { %653 = shalt.err (!%p650_p6)
}
 0x2fa   :  { %s654_s19 = scalar_lea.hbm %s783_s3, 128 }
 0x2fb   :  { %p655_p7 = scmp.ne.s32.totalorder %s783_s3, %s654_s19  ;;  %p658_p8 = scmp.lt.u32.totalorder %s654_s19, %s783_s3 }
 0x2fd   :  { %p660_p9 = pnand %p658_p8, %p655_p7 }
 0x2ff   :  { %663 = shalt.err (!%p660_p9)
}
 0x300   :  { %344 = dma.vmem_to_hbm [thread:$0]  %s342_s16, 128, %s783_s3, [#allocation4]  }
 0x301   :  { %668 = dma.done.wait [#allocation4], 128  }
 0x302   :  { %669 = vsyncadd [#allocation4], 4294967168 }
 0x303   :  { %348 = vsyncpa [#allocation3], 1 }
 0x304   :  { %349 = vsyncpa [#allocation6], 1 }
 0x305   :  { %350 = vsyncpa [#allocation4], 1 }

</bundles_post_ra>
